<compile_context>
chip_gen: v6e
topology: v6e:2x2x1
jax: 0.10.0
libtpu: 0.0.40
codegen_flags: <defaults>
</compile_context>

<pallas_src>
import jax
import jax.numpy as jnp
from jax.experimental import pallas as pl
from jax.experimental.pallas import tpu as pltpu


def _round_up(x, m):
    return (x + m - 1) // m * m


# --------------------- PromptEncoder fused MLP kernel ---------------------

def _prompt_mlp_kernel(x_ref, w1_ref, b1_ref, w2_ref, b2_ref, w3_ref, b3_ref,
                       o_ref):
    # fc1 + ReLU : bf16 operands on the MXU, f32 accumulation / f32 epilogue
    h = jnp.dot(x_ref[...].astype(jnp.bfloat16), w1_ref[...],
                preferred_element_type=jnp.float32)
    h = jnp.maximum(h + b1_ref[...], 0.0)
    # fc2 + ReLU
    h = jnp.dot(h.astype(jnp.bfloat16), w2_ref[...],
                preferred_element_type=jnp.float32)
    h = jnp.maximum(h + b2_ref[...], 0.0)
    # fc3 (no activation)
    h = jnp.dot(h.astype(jnp.bfloat16), w3_ref[...],
                preferred_element_type=jnp.float32)
    o_ref[...] = (h + b3_ref[...]).astype(o_ref.dtype)


def prompt_encoder_forward(embeddings, params, *, tile_b=128):
    """embeddings: [B, E] f32. params: bf16 weights [in,out], f32 biases [1,out].

    Batch is tiled over a 1-D "parallel" grid; weight/bias BlockSpecs use a
    constant index_map so they are DMA'd once and stay resident in VMEM.
    """
    w1, b1 = params["w1"], params["b1"]
    w2, b2 = params["w2"], params["b2"]
    w3, b3 = params["w3"], params["b3"]
    B, E = embeddings.shape
    H1 = w1.shape[1]
    H2 = w2.shape[1]
    O = w3.shape[1]

    tb = min(tile_b, _round_up(B, 8))
    Bp = _round_up(B, tb)
    if Bp != B:
        embeddings = jnp.pad(embeddings, ((0, Bp - B), (0, 0)))
    grid = (Bp // tb,)

    const = lambda i: (0, 0)  # weights/biases: same block for every batch tile

    flops = 2 * Bp * (E * H1 + H1 * H2 + H2 * O)
    bytes_accessed = (Bp * E * 4 + Bp * O * 4
                      + (E * H1 + H1 * H2 + H2 * O) * 2   # bf16 weights
                      + (H1 + H2 + O) * 4)                 # f32 biases

    out = pl.pallas_call(
        _prompt_mlp_kernel,
        out_shape=jax.ShapeDtypeStruct((Bp, O), jnp.float32),
        grid=grid,
        in_specs=[
            pl.BlockSpec((tb, E), lambda i: (i, 0)),
            pl.BlockSpec((E, H1), const), pl.BlockSpec((1, H1), const),
            pl.BlockSpec((H1, H2), const), pl.BlockSpec((1, H2), const),
            pl.BlockSpec((H2, O), const), pl.BlockSpec((1, O), const),
        ],
        out_specs=pl.BlockSpec((tb, O), lambda i: (i, 0)),
        compiler_params=pltpu.CompilerParams(
            dimension_semantics=("parallel",)),
        cost_estimate=pl.CostEstimate(flops=flops, transcendentals=0,
                                      bytes_accessed=bytes_accessed),
    )(embeddings, w1, b1, w2, b2, w3, b3)
    return out[:B]


# -------- posterior sampling + prompt-embedding broadcast-add kernel --------

def _latent_fuse_kernel(m_ref, logs_ref, eps_ref, mask_ref, te_ref, z_ref):
    # z = (m + eps * exp(logs)) * y_mask + text_embedding (broadcast over time)
    z = (m_ref[...] + eps_ref[...] * jnp.exp(logs_ref[...])) * mask_ref[...]
    z_ref[...] = (z + te_ref[...]).astype(z_ref.dtype)


def latent_fuse_forward(m, logs, eps, y_lengths, text_embedding):
    """m/logs/eps: [B, C, T] f32, y_lengths: [B] int, text_embedding: [B, C] f32."""
    B, C, T = m.shape
    y_mask = (jnp.arange(T)[None, :] < y_lengths[:, None]).astype(
        m.dtype)[:, None, :]                      # [B, 1, T]
    te = text_embedding[:, :, None]               # [B, C, 1]  (unsqueeze(-1))

    per_row = lambda b: (b, 0, 0)
    z = pl.pallas_call(
        _latent_fuse_kernel,
        out_shape=jax.ShapeDtypeStruct((B, C, T), jnp.float32),
        grid=(B,),
        in_specs=[
            pl.BlockSpec((1, C, T), per_row),
            pl.BlockSpec((1, C, T), per_row),
            pl.BlockSpec((1, C, T), per_row),
            pl.BlockSpec((1, 1, T), per_row),
            pl.BlockSpec((1, C, 1), per_row),
        ],
        out_specs=pl.BlockSpec((1, C, T), per_row),
        compiler_params=pltpu.CompilerParams(
            dimension_semantics=("parallel",)),
        cost_estimate=pl.CostEstimate(
            flops=5 * B * C * T,
            transcendentals=B * C * T,
            bytes_accessed=(4 * B * C * T + B * T + B * C) * 4),
    )(m, logs, eps, y_mask, te)
    return z, y_mask


# ------------------------------ params / refs ------------------------------

def init_params(key, embedding_dim, hidden_dim, output_dim):
    """nn.Linear-style init (uniform +-1/sqrt(fan_in)); weights stored
    transposed as [in_features, out_features] in bf16, biases f32 [1, out]."""
    def linear(k, fan_in, fan_out):
        kw, kb = jax.random.split(k)
        bound = float(fan_in) ** -0.5
        w = jax.random.uniform(kw, (fan_in, fan_out), jnp.float32, -bound, bound)
        b = jax.random.uniform(kb, (1, fan_out), jnp.float32, -bound, bound)
        return w.astype(jnp.bfloat16), b

    k1, k2, k3 = jax.random.split(key, 3)
    w1, b1 = linear(k1, embedding_dim, hidden_dim)
    w2, b2 = linear(k2, hidden_dim, hidden_dim)
    w3, b3 = linear(k3, hidden_dim, output_dim)
    return {"w1": w1, "b1": b1, "w2": w2, "b2": b2, "w3": w3, "b3": b3}


def reference_prompt_encoder(embeddings, params):
    def lin(x, w, b):
        return jnp.dot(x.astype(jnp.bfloat16), w,
                       preferred_element_type=jnp.float32) + b
    h = jnp.maximum(lin(embeddings, params["w1"], params["b1"]), 0.0)
    h = jnp.maximum(lin(h, params["w2"], params["b2"]), 0.0)
    return lin(h, params["w3"], params["b3"])


if __name__ == "__main__":
    # Small SynthesizerTrn-consistent shapes.
    batch = 16
    embedding_dim = 768      # stsb-xlm-r-multilingual sentence-embedding dim
    prompt_hidden = 256      # PromptEncoder(256, hidden_channels)
    hidden_channels = 192    # == inter_channels: text_embedding must match z channels
    T = 128                  # spectrogram frames

    key = jax.random.PRNGKey(0)
    k_emb, k_par, k_m, k_logs, k_eps, k_len = jax.random.split(key, 6)

    # TODO(synk): the frozen SentenceTransformer('stsb-xlm-r-multilingual')
    # encode() is an external transformer; we feed synthetic 768-d sentence
    # embeddings directly.
    embeddings = jax.random.normal(k_emb, (batch, embedding_dim), jnp.float32)
    params = init_params(k_par, embedding_dim, prompt_hidden, hidden_channels)

    # TODO(synk): PosteriorEncoder's 1x1 pre-conv + 16-layer WN gated-conv
    # stack + proj (and the HiFi-GAN Generator decoder + rand_slice_segments)
    # are not implemented; we feed synthetic (m, logs) stats of the right shape.
    m = jax.random.normal(k_m, (batch, hidden_channels, T), jnp.float32)
    logs = 0.1 * jax.random.normal(k_logs, (batch, hidden_channels, T), jnp.float32)
    eps = jax.random.normal(k_eps, (batch, hidden_channels, T), jnp.float32)
    y_lengths = jax.random.randint(k_len, (batch,), T // 2, T + 1)

    # Kernel path: PromptEncoder MLP -> posterior sample + prompt add.
    text_embedding = prompt_encoder_forward(embeddings, params, tile_b=8)
    z, y_mask = latent_fuse_forward(m, logs, eps, y_lengths, text_embedding)
    z = jax.block_until_ready(z)

    # Pure-JAX reference.
    te_ref = reference_prompt_encoder(embeddings, params)
    mask_ref = (jnp.arange(T)[None, :] < y_lengths[:, None]).astype(
        jnp.float32)[:, None, :]
    z_ref = (m + eps * jnp.exp(logs)) * mask_ref + te_ref[:, :, None]

    assert text_embedding.shape == (batch, hidden_channels)
    assert z.shape == (batch, hidden_channels, T)
    assert jnp.allclose(text_embedding, te_ref, atol=1e-3, rtol=1e-3)
    assert jnp.allclose(z, z_ref, atol=1e-3, rtol=1e-3)
    print("KERNEL_OK")
</pallas_src>

<mosaic_0001>
module attributes {stable_mosaic.version = 11 : i64} {
  func.func @_prompt_mlp_kernel(%arg0: i32, %arg1: memref<8x768xf32, #tpu.memory_space<vmem>>, %arg2: memref<768x256xbf16, #tpu.memory_space<vmem>>, %arg3: memref<1x256xf32, #tpu.memory_space<vmem>>, %arg4: memref<256x256xbf16, #tpu.memory_space<vmem>>, %arg5: memref<1x256xf32, #tpu.memory_space<vmem>>, %arg6: memref<256x192xbf16, #tpu.memory_space<vmem>>, %arg7: memref<1x192xf32, #tpu.memory_space<vmem>>, %arg8: memref<8x192xf32, #tpu.memory_space<vmem>>) attributes {dimension_semantics = [#tpu.dimension_semantics<parallel>], iteration_bounds = array<i64: 2>, scalar_prefetch = 0 : i64, scratch_operands = 0 : i64, tpu.core_type = #tpu.core_type<tc>, window_params = [{transform_indices = @transform_0, window_bounds = array<i64: 8, 768>}, {pipeline_mode = #tpu.pipeline_mode<synchronous>, transform_indices = @transform_1, window_bounds = array<i64: 768, 256>}, {pipeline_mode = #tpu.pipeline_mode<synchronous>, transform_indices = @transform_2, window_bounds = array<i64: 1, 256>}, {pipeline_mode = #tpu.pipeline_mode<synchronous>, transform_indices = @transform_3, window_bounds = array<i64: 256, 256>}, {pipeline_mode = #tpu.pipeline_mode<synchronous>, transform_indices = @transform_4, window_bounds = array<i64: 1, 256>}, {pipeline_mode = #tpu.pipeline_mode<synchronous>, transform_indices = @transform_5, window_bounds = array<i64: 256, 192>}, {pipeline_mode = #tpu.pipeline_mode<synchronous>, transform_indices = @transform_6, window_bounds = array<i64: 1, 192>}, {transform_indices = @transform_7, window_bounds = array<i64: 8, 192>}]} {
    %c0 = arith.constant 0 : index
    %c0_0 = arith.constant 0 : index
    %0 = vector.load %arg1[%c0, %c0_0] : memref<8x768xf32, #tpu.memory_space<vmem>>, vector<8x768xf32>
    %1 = arith.truncf %0 : vector<8x768xf32> to vector<8x768xbf16>
    %c0_1 = arith.constant 0 : index
    %c0_2 = arith.constant 0 : index
    %2 = vector.load %arg2[%c0_1, %c0_2] : memref<768x256xbf16, #tpu.memory_space<vmem>>, vector<768x256xbf16>
    %cst = arith.constant dense<0.000000e+00> : vector<8x256xf32>
    %3 = tpu.matmul %1, %2, %cst {dimension_numbers = #tpu.dot_dimension_numbers<[1], [0], [0], [1], [0, 0, 1, 1], [], []>} : vector<8x768xbf16>, vector<768x256xbf16>, vector<8x256xf32> -> vector<8x256xf32>
    %c0_3 = arith.constant 0 : index
    %c0_4 = arith.constant 0 : index
    %4 = vector.load %arg3[%c0_3, %c0_4] : memref<1x256xf32, #tpu.memory_space<vmem>>, vector<1x256xf32>
    %5 = vector.broadcast %4 : vector<1x256xf32> to vector<8x256xf32>
    %6 = arith.addf %3, %5 : vector<8x256xf32>
    %cst_5 = arith.constant 0.000000e+00 : f32
    %7 = vector.broadcast %cst_5 : f32 to vector<8x256xf32>
    %8 = arith.maximumf %6, %7 : vector<8x256xf32>
    %9 = arith.truncf %8 : vector<8x256xf32> to vector<8x256xbf16>
    %c0_6 = arith.constant 0 : index
    %c0_7 = arith.constant 0 : index
    %10 = vector.load %arg4[%c0_6, %c0_7] : memref<256x256xbf16, #tpu.memory_space<vmem>>, vector<256x256xbf16>
    %cst_8 = arith.constant dense<0.000000e+00> : vector<8x256xf32>
    %11 = tpu.matmul %9, %10, %cst_8 {dimension_numbers = #tpu.dot_dimension_numbers<[1], [0], [0], [1], [0, 0, 1, 1], [], []>} : vector<8x256xbf16>, vector<256x256xbf16>, vector<8x256xf32> -> vector<8x256xf32>
    %c0_9 = arith.constant 0 : index
    %c0_10 = arith.constant 0 : index
    %12 = vector.load %arg5[%c0_9, %c0_10] : memref<1x256xf32, #tpu.memory_space<vmem>>, vector<1x256xf32>
    %13 = vector.broadcast %12 : vector<1x256xf32> to vector<8x256xf32>
    %14 = arith.addf %11, %13 : vector<8x256xf32>
    %cst_11 = arith.constant 0.000000e+00 : f32
    %15 = vector.broadcast %cst_11 : f32 to vector<8x256xf32>
    %16 = arith.maximumf %14, %15 : vector<8x256xf32>
    %17 = arith.truncf %16 : vector<8x256xf32> to vector<8x256xbf16>
    %c0_12 = arith.constant 0 : index
    %c0_13 = arith.constant 0 : index
    %18 = vector.load %arg6[%c0_12, %c0_13] : memref<256x192xbf16, #tpu.memory_space<vmem>>, vector<256x192xbf16>
    %cst_14 = arith.constant dense<0.000000e+00> : vector<8x192xf32>
    %19 = tpu.matmul %17, %18, %cst_14 {dimension_numbers = #tpu.dot_dimension_numbers<[1], [0], [0], [1], [0, 0, 1, 1], [], []>} : vector<8x256xbf16>, vector<256x192xbf16>, vector<8x192xf32> -> vector<8x192xf32>
    %c0_15 = arith.constant 0 : index
    %c0_16 = arith.constant 0 : index
    %20 = vector.load %arg7[%c0_15, %c0_16] : memref<1x192xf32, #tpu.memory_space<vmem>>, vector<1x192xf32>
    %21 = vector.broadcast %20 : vector<1x192xf32> to vector<8x192xf32>
    %22 = arith.addf %19, %21 : vector<8x192xf32>
    %c0_17 = arith.constant 0 : index
    %c0_18 = arith.constant 0 : index
    %23 = vector.load %arg8[%c0_17, %c0_18] : memref<8x192xf32, #tpu.memory_space<vmem>>, vector<8x192xf32>
    tpu.vector_store %arg8[%c0_17, %c0_18], %22 {strides = array<i32>} : memref<8x192xf32, #tpu.memory_space<vmem>>, vector<8x192xf32>,
    return
  }
  func.func @transform_0(%arg0: i32) -> (i32, i32) {
    %c0_i32 = arith.constant 0 : i32
    %c0_i32_0 = arith.constant 0 : i32
    return %arg0, %c0_i32 : i32, i32
  }
  func.func @transform_1(%arg0: i32) -> (i32, i32) {
    %c0_i32 = arith.constant 0 : i32
    %c0_i32_0 = arith.constant 0 : i32
    %c0_i32_1 = arith.constant 0 : i32
    return %c0_i32, %c0_i32_0 : i32, i32
  }
  func.func @transform_2(%arg0: i32) -> (i32, i32) {
    %c0_i32 = arith.constant 0 : i32
    %c0_i32_0 = arith.constant 0 : i32
    %c0_i32_1 = arith.constant 0 : i32
    return %c0_i32, %c0_i32_0 : i32, i32
  }
  func.func @transform_3(%arg0: i32) -> (i32, i32) {
    %c0_i32 = arith.constant 0 : i32
    %c0_i32_0 = arith.constant 0 : i32
    %c0_i32_1 = arith.constant 0 : i32
    return %c0_i32, %c0_i32_0 : i32, i32
  }
  func.func @transform_4(%arg0: i32) -> (i32, i32) {
    %c0_i32 = arith.constant 0 : i32
    %c0_i32_0 = arith.constant 0 : i32
    %c0_i32_1 = arith.constant 0 : i32
    return %c0_i32, %c0_i32_0 : i32, i32
  }
  func.func @transform_5(%arg0: i32) -> (i32, i32) {
    %c0_i32 = arith.constant 0 : i32
    %c0_i32_0 = arith.constant 0 : i32
    %c0_i32_1 = arith.constant 0 : i32
    return %c0_i32, %c0_i32_0 : i32, i32
  }
  func.func @transform_6(%arg0: i32) -> (i32, i32) {
    %c0_i32 = arith.constant 0 : i32
    %c0_i32_0 = arith.constant 0 : i32
    %c0_i32_1 = arith.constant 0 : i32
    return %c0_i32, %c0_i32_0 : i32, i32
  }
  func.func @transform_7(%arg0: i32) -> (i32, i32) {
    %c0_i32 = arith.constant 0 : i32
    %c0_i32_0 = arith.constant 0 : i32
    return %arg0, %c0_i32 : i32, i32
  }
}

</mosaic_0001>

<bundles_post_ra>
// kernel: tpu_custom_call.1
= control target key start
LH: loop header
LB: loop body
LE: loop exit
PB: predicated region body
PF: predicated region fallthrough
CT: control target
= control target key end

     0   :  { %12 = vsyncpa [#allocation3], 0  ;;  %s2531_s0 = inlined_call_operand.vmem [shape: f32[16,768], index: 0, kind: input, shape index: {}]   ;;  %s2532_s1 = inlined_call_operand.hbm [shape: bf16[768,256], index: 1, kind: input, shape index: {}]   ;;  %s2533_s2 = inlined_call_operand.vmem [shape: f32[1,256], index: 2, kind: input, shape index: {}]   ;;  %s2534_s3 = inlined_call_operand.vmem [shape: bf16[256,256], index: 3, kind: input, shape index: {}]   ;;  %s2535_s4 = inlined_call_operand.vmem [shape: f32[1,256], index: 4, kind: input, shape index: {}]   ;;  %s2536_s5 = inlined_call_operand.vmem [shape: bf16[256,192], index: 5, kind: input, shape index: {}]   ;;  %s2537_s6 = inlined_call_operand.vmem [shape: f32[1,192], index: 6, kind: input, shape index: {}]   ;;  %s2538_s7 = inlined_call_operand.hbm [shape: f32[16,192], index: 7, kind: output, shape index: {}]  }
   0x1   :  { %13 = vsyncpa [#allocation4], 0 }
   0x2   :  { %15 = vsyncpa [#allocation4 + $0x1], 0  ;;  %s2205_s24 = smov 0   ;;  %s2207_s25 = smov 0  }
   0x3   :  { %s2209_s26 = smov 0   ;;  %s2211_s27 = smov 0  }
   0x4 LB: > { %s2226_s28 = sadd.s32 4294967295, %s2159_s27   ;;  %s1602_s29 = sadd.s32 4294967294, %s2159_s27   ;;  %s2159_s27 = sphi %s2211_s27, %s2546_s27   ;;  %s2155_s26 = sphi %s2209_s26, %s2545_s26   ;;  %s2151_s25 = sphi %s2207_s25, %s2544_s25   ;;  %s2147_s24 = sphi %s2205_s24, %s2543_s24  }
   0x5   : > { %s2230_s30 = sadd.s32 1, %s2159_s27   ;;  %s180_s8 = sadd.s32 1, %s2155_s26 }
   0x6   : > { %s177_s9 = ssub.s32 %s2159_s27, %s2230_s30  ;;  %p190_p0 = scmp.ne.s32.totalorder %s2155_s26, %s2151_s25 }
   0x7   : > { %p178_p1 = scmp.eq.s32.totalorder %s177_s9, 0  ;;  %p191_p2 = scmp.eq.s32.totalorder %s2226_s28, 1 }
   0x8   : > { %p196_p3 = scmp.ne.s32.totalorder %s2151_s25, %s2147_s24  ;;  %p197_p4 = scmp.eq.s32.totalorder %s1602_s29, 1 }
   0x9   : > { %s2241_s10 = scalar_select %p178_p1, %s2155_s26, %s180_s8  }
   0xa   : > { %p2243_p5 = por %p191_p2, %p190_p0  ;;  %p2247_p6 = por %p197_p4, %p196_p3 }
   0xb   : > { %p1603_p7 = scmp.ge.s32.totalorder %s2159_s27, 1  ;;  %p204_p8 = scmp.lt.s32.totalorder %s2159_s27, 3 }
   0xc   : > { %s2540_s12 = scalar_select %p2247_p6, 1, 0 }
   0xd   : > { %p1791_p9 = scmp.eq.s32.totalorder %s2226_s28, 0  ;;  %p2254_p10 = pnand %p1603_p7, %p204_p8 }
   0xe   : > { %s2161_s14 = smov [#allocation2]  }
   0xf   : > { %s216_s15 = sshll.u32 %s2161_s14, 4  ;;  %p1783_p11 = pneg %p2254_p10  ;;  %s217_s15 = int_to_ptr.vmem [resolvable:$true] %s216_s15 }
  0x10   : > { %s2080_s16 = scalar_lea.vmem %s217_s15, 12288  ;;  %p2088_p3 = scmp.lt.s32.totalorder %s217_s15, %s217_s15 }
  0x11   : > { %p1784_p12 = pnand %p1791_p9, %p1783_p11  ;;  %p2081_p0 = scmp.ne.s32.totalorder %s217_s15, %s2080_s16 }
  0x12   : > { %p2089_p4 = scmp.lt.s32.totalorder %s2080_s16, %s2080_s16 }
  0x13   : > { %p2071_p13 = pneg %p1784_p12 }
  0x14   : > { %p2090_p6 = por %p2089_p4, %p2088_p3 }
  0x15   : > { %p2083_p1 = pnand %p2081_p0, %p2071_p13 }
  0x17   : > { %p2084_p2 = pneg %p2083_p1 }
  0x19   : > { %p2091_p7 = pnand %p2090_p6, %p2084_p2 }
  0x1b   : > { %2094 = shalt.err (!%p2091_p7)
}
  0x1c   : > { %s2162_s17 = smov 128   ;;  %s2163_s18 = smov 8  }
  0x1d   : > { %1786 = dma.hbm_to_vmem [thread:$0]  (!%p1784_p12), %s2532_s1, 12288, %s217_s15, [#allocation3], %s2162_s17, %s2162_s17, %s2163_s18  }
  0x1e   : > { %255 = sbr.rel (%p2254_p10) target bundleno = 780 (0x30c), region = 48 }
  0x23   : > { %2138 = dma.done.wait (%p1791_p9), [#allocation3], 12288  }
  0x24   : > { %2140 = vsyncadd (%p1791_p9), [#allocation3], 4294955008  ;;  %v1829_v0 = vld [vmem:[#allocation2 + $0x74] ss:$8 sps:$4 sm:$0xff]   ;;  %v1831_v1 = vld [vmem:[#allocation2 + $0x70] ss:$8 sps:$4 sm:$0xff]  }
  0x25   : > { %892 = vmatprep.subr.bf16.mxu0 %v1829_v0  ;;  %v1832_v2 = vld [vmem:[#allocation2 + $0x174] ss:$8 sps:$4 sm:$0xff]   ;;  %v1834_v3 = vld [vmem:[#allocation2 + $0x170] ss:$8 sps:$4 sm:$0xff]   ;;  %v1835_v4 = vld [vmem:[#allocation2 + $0x64] ss:$8 sps:$4 sm:$0xff]  }
  0x26   : > { %893 = vmatpush1.bf16.msra.mxu0 %v1831_v1  ;;  %v1837_v5 = vld [vmem:[#allocation2 + $0x60] ss:$8 sps:$4 sm:$0xff]   ;;  %933 = vmatprep.subr.bf16.mxu1 %v1832_v2  ;;  %v1838_v6 = vld [vmem:[#allocation2 + $0x164] ss:$8 sps:$4 sm:$0xff]   ;;  %v1841_v8 = vld [vmem:[#allocation2 + $0x54] ss:$8 sps:$4 sm:$0xff]  }
  0x27   : > { %934 = vmatpush1.bf16.msra.mxu1 %v1834_v3  ;;  %894 = vmatprep.subr.bf16.mxu0 %v1835_v4  ;;  %v1840_v7 = vld [vmem:[#allocation2 + $0x160] ss:$8 sps:$4 sm:$0xff]   ;;  %v1843_v9 = vld [vmem:[#allocation2 + $0x50] ss:$8 sps:$4 sm:$0xff]   ;;  %v1844_v10 = vld [vmem:[#allocation2 + $0x154] ss:$8 sps:$4 sm:$0xff]  }
  0x28   : > { %935 = vmatprep.subr.bf16.mxu1 %v1838_v6  ;;  %v1847_v11 = vld [vmem:[#allocation2 + $0x44] ss:$8 sps:$4 sm:$0xff]   ;;  %v1846_v12 = vld [vmem:[#allocation2 + $0x150] ss:$8 sps:$4 sm:$0xff]   ;;  %v1849_v14 = vld [vmem:[#allocation2 + $0x40] ss:$8 sps:$4 sm:$0xff]  }
  0x29   : > { %v1850_v13 = vld [vmem:[#allocation2 + $0x144] ss:$8 sps:$4 sm:$0xff]   ;;  %v1853_v15 = vld [vmem:[#allocation2 + $0x34] ss:$8 sps:$4 sm:$0xff]   ;;  %v1852_v16 = vld [vmem:[#allocation2 + $0x140] ss:$8 sps:$4 sm:$0xff]  }
  0x2a   : > { %895 = vmatpush1.bf16.msra.mxu0 %v1837_v5  ;;  %v1856_v17 = vld [vmem:[#allocation2 + $0x134] ss:$8 sps:$4 sm:$0xff]   ;;  %v1855_v18 = vld [vmem:[#allocation2 + $0x30] ss:$8 sps:$4 sm:$0xff]   ;;  %v1859_v19 = vld [vmem:[#allocation2 + $0x24] ss:$8 sps:$4 sm:$0xff]  }
  0x2b   : > { %896 = vmatprep.subr.bf16.mxu0 %v1841_v8  ;;  %936 = vmatpush1.bf16.msra.mxu1 %v1840_v7  ;;  %v1858_v20 = vld [vmem:[#allocation2 + $0x130] ss:$8 sps:$4 sm:$0xff]   ;;  %v1862_v21 = vld [vmem:[#allocation2 + $0x124] ss:$8 sps:$4 sm:$0xff]   ;;  %v1861_v22 = vld [vmem:[#allocation2 + $0x20] ss:$8 sps:$4 sm:$0xff]  }
  0x2c   : > { %937 = vmatprep.subr.bf16.mxu1 %v1844_v10  ;;  %v1865_v23 = vld [vmem:[#allocation2 + $0x14] ss:$8 sps:$4 sm:$0xff]   ;;  %v1864_v24 = vld [vmem:[#allocation2 + $0x120] ss:$8 sps:$4 sm:$0xff]   ;;  %v1867_v26 = vld [vmem:[#allocation2 + $0x10] ss:$8 sps:$4 sm:$0xff]  }
  0x2d   : > { %v1868_v25 = vld [vmem:[#allocation2 + $0x114] ss:$8 sps:$4 sm:$0xff]   ;;  %v1871_v27 = vld [vmem:[#allocation2 + $0x4] ss:$8 sps:$4 sm:$0xff]   ;;  %v1870_v28 = vld [vmem:[#allocation2 + $0x110] ss:$8 sps:$4 sm:$0xff]  }
  0x2e   : > { %897 = vmatpush1.bf16.msra.mxu0 %v1843_v9  ;;  %v1874_v29 = vld [vmem:[#allocation2 + $0x104] ss:$8 sps:$4 sm:$0xff]   ;;  %v1873_v30 = vld [vmem:[#allocation2] ss:$8 sps:$4 sm:$0xff]   ;;  %p287_p6 = scmp.lt.s32.totalorder %s2226_s28, 1  ;;  %s284_s18 = sand.u32 1, %s2151_s25  }
  0x2f   : > { %898 = vmatprep.subr.bf16.mxu0 %v1847_v11  ;;  %938 = vmatpush1.bf16.msra.mxu1 %v1846_v12  ;;  %v1877_v31 = vld [vmem:[#allocation2 + $0xf4] ss:$8 sps:$4 sm:$0xff]   ;;  %v1876_v32 = vld [vmem:[#allocation2 + $0x100] ss:$8 sps:$4 sm:$0xff]   ;;  %v1879_v34 = vld [vmem:[#allocation2 + $0xf0] ss:$8 sps:$4 sm:$0xff]  }
  0x30   : > { %939 = vmatprep.subr.bf16.mxu1 %v1850_v13  ;;  %v1880_v33 = vld [vmem:[#allocation2 + $0x1f4] ss:$8 sps:$4 sm:$0xff]   ;;  %s288_s21 = scalar_select %p287_p6, %s2226_s28, 1  ;;  %v1883_v35 = vld [vmem:[#allocation2 + $0xe4] ss:$8 sps:$4 sm:$0xff]   ;;  %vm1514_vm0 = vcmask 523264  }
  0x31   : > { %v1882_v36 = vld [vmem:[#allocation2 + $0x1f0] ss:$8 sps:$4 sm:$0xff]   ;;  %v1886_v37 = vld [vmem:[#allocation2 + $0x1e4] ss:$8 sps:$4 sm:$0xff]   ;;  %v1885_v38 = vld [vmem:[#allocation2 + $0xe0] ss:$8 sps:$4 sm:$0xff]  }
  0x32   : > { %899 = vmatpush1.bf16.msra.mxu0 %v1849_v14  ;;  %s1776_s22 = smul.u32 48, %s288_s21  ;;  %v1889_v39 = vld [vmem:[#allocation2 + $0xd4] ss:$8 sps:$4 sm:$0xff]   ;;  %v1888_v40 = vld [vmem:[#allocation2 + $0x1e0] ss:$8 sps:$4 sm:$0xff]   ;;  %s1608_s19 = sshll.u32 %s284_s18, 4 }
  0x33   : > { %900 = vmatprep.subr.bf16.mxu0 %v1853_v15  ;;  %940 = vmatpush1.bf16.msra.mxu1 %v1852_v16  ;;  %v1892_v41 = vld [vmem:[#allocation2 + $0x1d4] ss:$8 sps:$4 sm:$0xff]   ;;  %v1891_v42 = vld [vmem:[#allocation2 + $0xd0] ss:$8 sps:$4 sm:$0xff]   ;;  %v1895_v43 = vld [vmem:[#allocation2 + $0xc4] ss:$8 sps:$4 sm:$0xff]  }
  0x34   : > { %941 = vmatprep.subr.bf16.mxu1 %v1856_v17  ;;  %s2276_s8 = scalar_lea.vmem %s2531_s0, %s1776_s22  ;;  %v1894_v44 = vld [vmem:[#allocation2 + $0x1d0] ss:$8 sps:$4 sm:$0xff]   ;;  %v1898_v45 = vld [vmem:[#allocation2 + $0x1c4] ss:$8 sps:$4 sm:$0xff]   ;;  %v1897_v47 = vld [vmem:[#allocation2 + $0xc0] ss:$8 sps:$4 sm:$0xff]  }
  0x35   : > { %v293_v46 = vld [vmem:[%s2276_s8 + $0x8] sm:$0xff]  ;;  %v1901_v49 = vld [vmem:[#allocation2 + $0xb4] ss:$8 sps:$4 sm:$0xff]   ;;  %v1903_v54 = vld [vmem:[#allocation2 + $0xb0] ss:$8 sps:$4 sm:$0xff]   ;;  %s1775_s22 = sshll.u32 %s2226_s28, 8 }
  0x36   : > { %901 = vmatpush1.bf16.msra.mxu0 %v1855_v18  ;;  %v299_v48 = vpack.c.bf16 %v293_v46, %v293_v46  ;;  %v295_v50 = vld [vmem:[%s2276_s8 + $0x18] sm:$0xff]  ;;  %v1900_v51 = vld [vmem:[#allocation2 + $0x1c0] ss:$8 sps:$4 sm:$0xff]   ;;  %v1907_v55 = vld [vmem:[#allocation2 + $0xa4] ss:$8 sps:$4 sm:$0xff]   ;;  %s286_s23 = scalar_lea.vmem [#allocation5], %s1608_s19  ;;  %s2490_s13 = scalar_lea.hbm %s2538_s7, %s1775_s22 }
  0x37   : > { %902 = vmatprep.subr.bf16.mxu0 %v1859_v19  ;;  %942 = vmatpush1.bf16.msra.mxu1 %v1858_v20  ;;  %v301_v52 = vpack.c.bf16 %v295_v50, %v295_v50  ;;  %v1904_v53 = vld [vmem:[#allocation2 + $0x1b4] ss:$8 sps:$4 sm:$0xff]   ;;  %v1906_v56 = vld [vmem:[#allocation2 + $0x1b0] ss:$8 sps:$4 sm:$0xff]   ;;  %v1910_v57 = vld [vmem:[#allocation2 + $0x1a4] ss:$8 sps:$4 sm:$0xff]  }
  0x38   : > { %943 = vmatprep.subr.bf16.mxu1 %v1862_v21  ;;  %924 = vmatprep.mubr.bf16.mxu0 %v299_v48  ;;  %v1909_v58 = vld [vmem:[#allocation2 + $0xa0] ss:$8 sps:$4 sm:$0xff]   ;;  %v1913_v59 = vld [vmem:[#allocation2 + $0x94] ss:$8 sps:$4 sm:$0xff]   ;;  %v1915_v62 = vld [vmem:[#allocation2 + $0x90] ss:$8 sps:$4 sm:$0xff]  }
  0x39   : > { %965 = vmatprep.mubr.bf16.mxu1 %v301_v52  ;;  %v1912_v60 = vld [vmem:[#allocation2 + $0x1a0] ss:$8 sps:$4 sm:$0xff]   ;;  %v1916_v61 = vld [vmem:[#allocation2 + $0x194] ss:$8 sps:$4 sm:$0xff]   ;;  %v1919_v63 = vld [vmem:[#allocation2 + $0x84] ss:$8 sps:$4 sm:$0xff]  }
  0x3a   : > { %903 = vmatpush1.bf16.msra.mxu0 %v1861_v22  ;;  %v1918_v0 = vld [vmem:[#allocation2 + $0x190] ss:$8 sps:$4 sm:$0xff]   ;;  %v1921_v1 = vld [vmem:[#allocation2 + $0x80] ss:$8 sps:$4 sm:$0xff]   ;;  %v1922_v2 = vld [vmem:[#allocation2 + $0x184] ss:$8 sps:$4 sm:$0xff]  }
  0x3b   : > { %904 = vmatprep.subr.bf16.mxu0 %v1865_v23  ;;  %944 = vmatpush1.bf16.msra.mxu1 %v1864_v24  ;;  %v1924_v3 = vld [vmem:[#allocation2 + $0x180] ss:$8 sps:$4 sm:$0xff]   ;;  %v1927_v5 = vld [vmem:[#allocation2 + $0x274] ss:$8 sps:$4 sm:$0xff]   ;;  %v1925_v8 = vld [vmem:[#allocation2 + $0x270] ss:$8 sps:$4 sm:$0xff]  }
  0x3c   : > { %945 = vmatprep.subr.bf16.mxu1 %v1868_v25  ;;  %v292_v4 = vld [vmem:[%s2276_s8] sm:$0xff]  ;;  %v294_v6 = vld [vmem:[%s2276_s8 + $0x10] sm:$0xff]  ;;  %v297_v12 = vld [vmem:[%s2276_s8 + $0x28] sm:$0xff]  ;;  %s1531_s29 = sshll.u32 %s286_s23, 4  ;;  %s1517_s28 = scalar_lea.sflag [#allocation4], %s284_s18  ;;  %s2492_s29 = int_to_ptr.vmem [resolvable:$true] %s1531_s29 }
  0x3d   : > { %v298_v7 = vpack.c.bf16 %v292_v4, %v292_v4  ;;  %v300_v9 = vpack.c.bf16 %v294_v6, %v294_v6  ;;  %v1930_v10 = vld [vmem:[#allocation2 + $0x264] ss:$8 sps:$4 sm:$0xff]   ;;  %v1928_v11 = vld [vmem:[#allocation2 + $0x260] ss:$8 sps:$4 sm:$0xff]   ;;  %v1933_v13 = vld [vmem:[#allocation2 + $0x254] ss:$8 sps:$4 sm:$0xff]   ;;  %v303_v14 = vpack.c.bf16 %v297_v12, %v297_v12 }
  0x3e   : > { %905 = vmatpush1.bf16.msra.mxu0 %v1867_v26  ;;  %v1931_v15 = vld [vmem:[#allocation2 + $0x250] ss:$8 sps:$4 sm:$0xff]   ;;  %v1936_v16 = vld [vmem:[#allocation2 + $0x244] ss:$8 sps:$4 sm:$0xff]   ;;  %v1934_v17 = vld [vmem:[#allocation2 + $0x240] ss:$8 sps:$4 sm:$0xff]  }
  0x3f   : > { %906 = vmatprep.subr.bf16.mxu0 %v1871_v27  ;;  %946 = vmatpush1.bf16.msra.mxu1 %v1870_v28  ;;  %v1939_v18 = vld [vmem:[#allocation2 + $0x234] ss:$8 sps:$4 sm:$0xff]   ;;  %v1937_v19 = vld [vmem:[#allocation2 + $0x230] ss:$8 sps:$4 sm:$0xff]   ;;  %v1942_v20 = vld [vmem:[#allocation2 + $0x224] ss:$8 sps:$4 sm:$0xff]  }
  0x40   : > { %947 = vmatprep.subr.bf16.mxu1 %v1874_v29  ;;  %v1940_v21 = vld [vmem:[#allocation2 + $0x220] ss:$8 sps:$4 sm:$0xff]   ;;  %v1945_v22 = vld [vmem:[#allocation2 + $0x214] ss:$8 sps:$4 sm:$0xff]   ;;  %v1943_v23 = vld [vmem:[#allocation2 + $0x210] ss:$8 sps:$4 sm:$0xff]  }
  0x41   : > { %v1948_v24 = vld [vmem:[#allocation2 + $0x204] ss:$8 sps:$4 sm:$0xff]   ;;  %v1946_v25 = vld [vmem:[#allocation2 + $0x200] ss:$8 sps:$4 sm:$0xff]   ;;  %v1951_v26 = vld [vmem:[#allocation2 + $0x2f4] ss:$8 sps:$4 sm:$0xff]  }
  0x42   : > { %907 = vmatpush1.bf16.msra.mxu0 %v1873_v30  ;;  %v1949_v27 = vld [vmem:[#allocation2 + $0x2f0] ss:$8 sps:$4 sm:$0xff]   ;;  %v1954_v28 = vld [vmem:[#allocation2 + $0x2e4] ss:$8 sps:$4 sm:$0xff]   ;;  %v1952_v29 = vld [vmem:[#allocation2 + $0x2e0] ss:$8 sps:$4 sm:$0xff]  }
  0x43   : > { %908 = vmatprep.subr.bf16.mxu0 %v1877_v31  ;;  %948 = vmatpush1.bf16.msra.mxu1 %v1876_v32  ;;  %v1957_v30 = vld [vmem:[#allocation2 + $0x2d4] ss:$8 sps:$4 sm:$0xff]   ;;  %v1955_v31 = vld [vmem:[#allocation2 + $0x2d0] ss:$8 sps:$4 sm:$0xff]   ;;  %v1960_v32 = vld [vmem:[#allocation2 + $0x2c4] ss:$8 sps:$4 sm:$0xff]  }
  0x44   : > { %949 = vmatprep.subr.bf16.mxu1 %v1880_v33  ;;  %v1958_v33 = vld [vmem:[#allocation2 + $0x2c0] ss:$8 sps:$4 sm:$0xff]   ;;  %v1978_v46 = vld [vmem:[%s2534_s3 + $0x64] ss:$8 sps:$4 sm:$0xff]   ;;  %v1981_v48 = vld [vmem:[%s2534_s3 + $0x54] ss:$8 sps:$4 sm:$0xff]  }
  0x45   : > { %v1984_v50 = vld [vmem:[%s2534_s3 + $0x44] ss:$8 sps:$4 sm:$0xff]   ;;  %v1987_v52 = vld [vmem:[%s2534_s3 + $0x34] ss:$8 sps:$4 sm:$0xff]   ;;  %v2021_v12 = vld [vmem:[%s2536_s5 + $0x70] ss:$8 sps:$4 sm:$0xff]  }
  0x46   : > { %909 = vmatpush2.bf16.msra.mxu0 %v1879_v34  ;;  %v1963_v34 = vld [vmem:[#allocation2 + $0x2b4] ss:$8 sps:$4 sm:$0xff]   ;;  %v2014_v6 = vld [vmem:[%s2534_s3 + $0xa4] ss:$8 sps:$4 sm:$0xff]   ;;  %s2095_s14 = scalar_lea.vmem %s2492_s29, 256  ;;  %s2164_s15 = smov [#allocation5]  }
  0x47   : > { %910 = vmatprep.subr.bf16.mxu0 %v1883_v35  ;;  %950 = vmatpush2.bf16.msra.mxu1 %v1882_v36  ;;  %v1961_v35 = vld [vmem:[#allocation2 + $0x2b0] ss:$8 sps:$4 sm:$0xff]   ;;  %v1966_v36 = vld [vmem:[#allocation2 + $0x2a4] ss:$8 sps:$4 sm:$0xff]   ;;  %v2011_v4 = vld [vmem:[%s2534_s3 + $0xb4] ss:$8 sps:$4 sm:$0xff]   ;;  %p2096_p8 = scmp.ne.s32.totalorder %s2492_s29, %s2095_s14 }
  0x48   : > { %951 = vmatprep.subr.bf16.mxu1 %v1886_v37  ;;  %v1964_v37 = vld [vmem:[#allocation2 + $0x2a0] ss:$8 sps:$4 sm:$0xff]   ;;  %s2099_s16 = sshll.u32 %s2164_s15, 4  ;;  %s2100_s16 = int_to_ptr.vmem [resolvable:$false] %s2099_s16 }
  0x49   : > { %p2097_p9 = pnand %p2096_p8, %p2243_p5  ;;  %s2101_s17 = scalar_lea.vmem %s2100_s16, 512 }
  0x4a   : > { %911 = vmatpush2.bf16.msra.mxu0 %v1885_v38  ;;  %v1969_v38 = vld [vmem:[#allocation2 + $0x294] ss:$8 sps:$4 sm:$0xff]   ;;  %p2102_p11 = scmp.lt.s32.totalorder %s2492_s29, %s2100_s16  ;;  %p2103_p12 = scmp.lt.s32.totalorder %s2101_s17, %s2095_s14 }
  0x4b   : > { %912 = vmatprep.subr.bf16.mxu0 %v1889_v39  ;;  %952 = vmatpush2.bf16.msra.mxu1 %v1888_v40  ;;  %v1967_v39 = vld [vmem:[#allocation2 + $0x290] ss:$8 sps:$4 sm:$0xff]   ;;  %v1972_v40 = vld [vmem:[#allocation2 + $0x284] ss:$8 sps:$4 sm:$0xff]   ;;  %p2098_p10 = pneg %p2097_p9 }
  0x4c   : > { %953 = vmatprep.subr.bf16.mxu1 %v1892_v41  ;;  %v1970_v41 = vld [vmem:[#allocation2 + $0x280] ss:$8 sps:$4 sm:$0xff]   ;;  %p2104_p13 = por %p2103_p12, %p2102_p11 }
  0x4e   : > { %913 = vmatpush2.bf16.msra.mxu0 %v1891_v42  ;;  %v296_v42 = vld [vmem:[%s2276_s8 + $0x20] sm:$0xff]  ;;  %p2105_p0 = pnand %p2104_p13, %p2098_p10 }
  0x4f   : > { %914 = vmatprep.subr.bf16.mxu0 %v1895_v43  ;;  %954 = vmatpush2.bf16.msra.mxu1 %v1894_v44  ;;  %v302_v43 = vpack.c.bf16 %v296_v42, %v296_v42  ;;  %v1973_v44 = vld [vmem:[%s2534_s3 + $0x70] ss:$8 sps:$4 sm:$0xff]  }
  0x50   : > { %955 = vmatprep.subr.bf16.mxu1 %v1898_v45  ;;  %v1975_v45 = vld [vmem:[%s2534_s3 + $0x74] ss:$8 sps:$4 sm:$0xff]  }
  0x52   : > { %915 = vmatpush2.bf16.msra.mxu0 %v1897_v47  ;;  %v1976_v47 = vld [vmem:[%s2534_s3 + $0x60] ss:$8 sps:$4 sm:$0xff]  }
  0x53   : > { %916 = vmatprep.subr.bf16.mxu0 %v1901_v49  ;;  %956 = vmatpush2.bf16.msra.mxu1 %v1900_v51  ;;  %v1979_v49 = vld [vmem:[%s2534_s3 + $0x50] ss:$8 sps:$4 sm:$0xff]   ;;  %v1982_v51 = vld [vmem:[%s2534_s3 + $0x40] ss:$8 sps:$4 sm:$0xff]  }
  0x54   : > { %957 = vmatprep.subr.bf16.mxu1 %v1904_v53  ;;  %v1985_v53 = vld [vmem:[%s2534_s3 + $0x30] ss:$8 sps:$4 sm:$0xff]  }
  0x56   : > { %917 = vmatpush2.bf16.msra.mxu0 %v1903_v54  ;;  %v1990_v54 = vld [vmem:[%s2534_s3 + $0x24] ss:$8 sps:$4 sm:$0xff]  }
  0x57   : > { %918 = vmatprep.subr.bf16.mxu0 %v1907_v55  ;;  %958 = vmatpush2.bf16.msra.mxu1 %v1906_v56  ;;  %v1988_v55 = vld [vmem:[%s2534_s3 + $0x20] ss:$8 sps:$4 sm:$0xff]   ;;  %v1993_v56 = vld [vmem:[%s2534_s3 + $0x14] ss:$8 sps:$4 sm:$0xff]  }
  0x58   : > { %959 = vmatprep.subr.bf16.mxu1 %v1910_v57  ;;  %v1991_v57 = vld [vmem:[%s2534_s3 + $0x10] ss:$8 sps:$4 sm:$0xff]  }
  0x5a   : > { %919 = vmatpush2.bf16.msra.mxu0 %v1909_v58  ;;  %v1996_v58 = vld [vmem:[%s2534_s3 + $0x4] ss:$8 sps:$4 sm:$0xff]  }
  0x5b   : > { %920 = vmatprep.subr.bf16.mxu0 %v1913_v59  ;;  %960 = vmatpush2.bf16.msra.mxu1 %v1912_v60  ;;  %v1994_v59 = vld [vmem:[%s2534_s3] ss:$8 sps:$4 sm:$0xff]   ;;  %v1999_v60 = vld [vmem:[%s2534_s3 + $0xf4] ss:$8 sps:$4 sm:$0xff]  }
  0x5c   : > { %961 = vmatprep.subr.bf16.mxu1 %v1916_v61  ;;  %v1997_v61 = vld [vmem:[%s2534_s3 + $0xf0] ss:$8 sps:$4 sm:$0xff]  }
  0x5e   : > { %921 = vmatpush2.bf16.msra.mxu0 %v1915_v62  ;;  %v2002_v62 = vld [vmem:[%s2534_s3 + $0xe4] ss:$8 sps:$4 sm:$0xff]  }
  0x5f   : > { %922 = vmatprep.subr.bf16.mxu0 %v1919_v63  ;;  %962 = vmatpush2.bf16.msra.mxu1 %v1918_v0  ;;  %v2000_v63 = vld [vmem:[%s2534_s3 + $0xe0] ss:$8 sps:$4 sm:$0xff]   ;;  %v2005_v0 = vld [vmem:[%s2534_s3 + $0xd4] ss:$8 sps:$4 sm:$0xff]  }
  0x60   : > { %963 = vmatprep.subr.bf16.mxu1 %v1922_v2  ;;  %v2008_v2 = vld [vmem:[%s2534_s3 + $0xc4] ss:$8 sps:$4 sm:$0xff]  }
  0x62   : > { %923 = vmatpush2.bf16.msra.mxu0 %v1921_v1  ;;  %v2003_v1 = vld [vmem:[%s2534_s3 + $0xd0] ss:$8 sps:$4 sm:$0xff]  }
  0x63   : > { %974 = vmatprep.subr.bf16.mxu0 %v1927_v5  ;;  %964 = vmatpush2.bf16.msra.mxu1 %v1924_v3  ;;  %v2006_v3 = vld [vmem:[%s2534_s3 + $0xc0] ss:$8 sps:$4 sm:$0xff]   ;;  %v2009_v5 = vld [vmem:[%s2534_s3 + $0xb0] ss:$8 sps:$4 sm:$0xff]  }
  0x64   : > { %1223 = vmatprep.subr.bf16.mxu1 %v1975_v45 }
  0x65   : > { %925 = vmatmul.mubr.bf16.vlgmr.msra.gmra.mxu0 %v298_v7  ;;  %v2012_v7 = vld [vmem:[%s2534_s3 + $0xa0] ss:$8 sps:$4 sm:$0xff]  }
  0x66   : > { %975 = vmatpush1.bf16.msra.mxu0 %v1925_v8  ;;  %966 = vmatmul.mubr.bf16.vlgmr.msra.gmra.mxu1 %v300_v9  ;;  %v2017_v8 = vld [vmem:[%s2534_s3 + $0x94] ss:$8 sps:$4 sm:$0xff]   ;;  %v2015_v9 = vld [vmem:[%s2534_s3 + $0x90] ss:$8 sps:$4 sm:$0xff]  }
  0x67   : > { %976 = vmatprep.subr.bf16.mxu0 %v1930_v10  ;;  %1006 = vmatprep.mubr.bf16.mxu0 %v303_v14  ;;  %v2020_v10 = vld [vmem:[%s2534_s3 + $0x84] ss:$8 sps:$4 sm:$0xff]  }
  0x68   : > { %1224 = vmatpush1.bf16.msra.mxu1 %v1973_v44  ;;  %v2026_v14 = vld [vmem:[%s2536_s5 + $0x64] ss:$8 sps:$4 sm:$0xff]  }
  0x69   : > { %1225 = vmatprep.subr.bf16.mxu1 %v1978_v46 }
  0x6a   : > { %977 = vmatpush1.bf16.msra.mxu0 %v1928_v11  ;;  %v2018_v11 = vld [vmem:[%s2534_s3 + $0x80] ss:$8 sps:$4 sm:$0xff]  }
  0x6b   : > { %978 = vmatprep.subr.bf16.mxu0 %v1933_v13  ;;  %v2023_v13 = vld [vmem:[%s2536_s5 + $0x74] ss:$8 sps:$4 sm:$0xff]  }
  0x6c   : > { %1226 = vmatpush1.bf16.msra.mxu1 %v1976_v47 }
  0x6d   : > { %1227 = vmatprep.subr.bf16.mxu1 %v1981_v48  ;;  %v402_v48 = vlaneseq }
  0x6e   : > { %979 = vmatpush1.bf16.msra.mxu0 %v1931_v15  ;;  %v2024_v15 = vld [vmem:[%s2536_s5 + $0x60] ss:$8 sps:$4 sm:$0xff]  }
  0x6f   : > { %980 = vmatprep.subr.bf16.mxu0 %v1936_v16  ;;  %v2029_v16 = vld [vmem:[%s2536_s5 + $0x54] ss:$8 sps:$4 sm:$0xff]  }
  0x70   : > { %1228 = vmatpush1.bf16.msra.mxu1 %v1979_v49  ;;  %v403_v49 = vshrl.u32 %v402_v48, 7 }
  0x71   : > { %1229 = vmatprep.subr.bf16.mxu1 %v1984_v50 }
  0x72   : > { %981 = vmatpush1.bf16.msra.mxu0 %v1934_v17  ;;  %v2027_v17 = vld [vmem:[%s2536_s5 + $0x50] ss:$8 sps:$4 sm:$0xff]   ;;  %v404_v50 = vsub.s32 0, %v403_v49 }
  0x73   : > { %982 = vmatprep.subr.bf16.mxu0 %v1939_v18  ;;  %v2032_v18 = vld [vmem:[%s2536_s5 + $0x44] ss:$8 sps:$4 sm:$0xff]  }
  0x74   : > { %1230 = vmatpush1.bf16.msra.mxu1 %v1982_v51  ;;  %v400_v51 = vld [vmem:[%s2533_s2] sm:$0x3] }
  0x75   : > { %1231 = vmatprep.subr.bf16.mxu1 %v1987_v52  ;;  %v408_v52 = vsub.s32 1, %v403_v49 }
  0x76   : > { %983 = vmatpush1.bf16.msra.mxu0 %v1937_v19  ;;  %v2030_v19 = vld [vmem:[%s2536_s5 + $0x40] ss:$8 sps:$4 sm:$0xff]  }
  0x77   : > { %984 = vmatprep.subr.bf16.mxu0 %v1942_v20  ;;  %v2035_v20 = vld [vmem:[%s2536_s5 + $0x34] ss:$8 sps:$4 sm:$0xff]  }
  0x78   : > { %1232 = vmatpush1.bf16.msra.mxu1 %v1985_v53  ;;  %v405_v53 = vrot.slane %v400_v51, %v404_v50 }
  0x79   : > { %1233 = vmatprep.subr.bf16.mxu1 %v1990_v54  ;;  %v409_v54 = vrot.slane %v400_v51, %v408_v52 }
  0x7a   : > { %985 = vmatpush1.bf16.msra.mxu0 %v1940_v21  ;;  %v2033_v21 = vld [vmem:[%s2536_s5 + $0x30] ss:$8 sps:$4 sm:$0xff]  }
  0x7b   : > { %986 = vmatprep.subr.bf16.mxu0 %v1945_v22  ;;  %v2038_v22 = vld [vmem:[%s2536_s5 + $0x24] ss:$8 sps:$4 sm:$0xff]  }
  0x7c   : > { %1234 = vmatpush1.bf16.msra.mxu1 %v1988_v55 }
  0x7d   : > { %1235 = vmatprep.subr.bf16.mxu1 %v1993_v56 }
  0x7e   : > { %987 = vmatpush1.bf16.msra.mxu0 %v1943_v23  ;;  %v2036_v23 = vld [vmem:[%s2536_s5 + $0x20] ss:$8 sps:$4 sm:$0xff]  }
  0x7f   : > { %988 = vmatprep.subr.bf16.mxu0 %v1948_v24  ;;  %v2041_v24 = vld [vmem:[%s2536_s5 + $0x14] ss:$8 sps:$4 sm:$0xff]  }
  0x80   : > { %1236 = vmatpush1.bf16.msra.mxu1 %v1991_v57 }
  0x81   : > { %1237 = vmatprep.subr.bf16.mxu1 %v1996_v58 }
  0x82   : > { %989 = vmatpush1.bf16.msra.mxu0 %v1946_v25  ;;  %v2039_v25 = vld [vmem:[%s2536_s5 + $0x10] ss:$8 sps:$4 sm:$0xff]  }
  0x83   : > { %990 = vmatprep.subr.bf16.mxu0 %v1951_v26  ;;  %v2044_v26 = vld [vmem:[%s2536_s5 + $0x4] ss:$8 sps:$4 sm:$0xff]  }
  0x84   : > { %1238 = vmatpush1.bf16.msra.mxu1 %v1994_v59 }
  0x85   : > { %1239 = vmatprep.subr.bf16.mxu1 %v1999_v60 }
  0x86   : > { %991 = vmatpush2.bf16.msra.mxu0 %v1949_v27  ;;  %v2042_v27 = vld [vmem:[%s2536_s5] ss:$8 sps:$4 sm:$0xff]  }
  0x87   : > { %992 = vmatprep.subr.bf16.mxu0 %v1954_v28  ;;  %v2047_v28 = vld [vmem:[%s2536_s5 + $0xf4] ss:$8 sps:$4 sm:$0xff]  }
  0x88   : > { %1240 = vmatpush2.bf16.msra.mxu1 %v1997_v61 }
  0x89   : > { %1241 = vmatprep.subr.bf16.mxu1 %v2002_v62 }
  0x8a   : > { %993 = vmatpush2.bf16.msra.mxu0 %v1952_v29  ;;  %v2045_v29 = vld [vmem:[%s2536_s5 + $0xf0] ss:$8 sps:$4 sm:$0xff]  }
  0x8b   : > { %994 = vmatprep.subr.bf16.mxu0 %v1957_v30  ;;  %v2050_v30 = vld [vmem:[%s2536_s5 + $0xe4] ss:$8 sps:$4 sm:$0xff]  }
  0x8c   : > { %1242 = vmatpush2.bf16.msra.mxu1 %v2000_v63 }
  0x8d   : > { %1243 = vmatprep.subr.bf16.mxu1 %v2005_v0 }
  0x8e   : > { %995 = vmatpush2.bf16.msra.mxu0 %v1955_v31  ;;  %v2048_v31 = vld [vmem:[%s2536_s5 + $0xe0] ss:$8 sps:$4 sm:$0xff]  }
  0x8f   : > { %996 = vmatprep.subr.bf16.mxu0 %v1960_v32  ;;  %v2053_v32 = vld [vmem:[%s2536_s5 + $0xd4] ss:$8 sps:$4 sm:$0xff]  }
  0x90   : > { %1244 = vmatpush2.bf16.msra.mxu1 %v2003_v1 }
  0x91   : > { %1245 = vmatprep.subr.bf16.mxu1 %v2008_v2 }
  0x92   : > { %997 = vmatpush2.bf16.msra.mxu0 %v1958_v33  ;;  %v2051_v33 = vld [vmem:[%s2536_s5 + $0xd0] ss:$8 sps:$4 sm:$0xff]  }
  0x93   : > { %998 = vmatprep.subr.bf16.mxu0 %v1963_v34  ;;  %v2056_v34 = vld [vmem:[%s2536_s5 + $0xc4] ss:$8 sps:$4 sm:$0xff]  }
  0x94   : > { %1246 = vmatpush2.bf16.msra.mxu1 %v2006_v3 }
  0x95   : > { %1247 = vmatprep.subr.bf16.mxu1 %v2011_v4 }
  0x96   : > { %999 = vmatpush2.bf16.msra.mxu0 %v1961_v35  ;;  %v2054_v35 = vld [vmem:[%s2536_s5 + $0xc0] ss:$8 sps:$4 sm:$0xff]  }
  0x97   : > { %1000 = vmatprep.subr.bf16.mxu0 %v1966_v36  ;;  %v2059_v36 = vld [vmem:[%s2536_s5 + $0xb4] ss:$8 sps:$4 sm:$0xff]  }
  0x98   : > { %1248 = vmatpush2.bf16.msra.mxu1 %v2009_v5  ;;  %v2065_v5 = vld [vmem:[%s2536_s5 + $0x94] ss:$8 sps:$4 sm:$0xff]  }
  0x99   : > { %1249 = vmatprep.subr.bf16.mxu1 %v2014_v6  ;;  %v2063_v6 = vld [vmem:[%s2536_s5 + $0x90] ss:$8 sps:$4 sm:$0xff]  }
  0x9a   : > { %1001 = vmatpush2.bf16.msra.mxu0 %v1964_v37  ;;  %v2057_v37 = vld [vmem:[%s2536_s5 + $0xb0] ss:$8 sps:$4 sm:$0xff]  }
  0x9b   : > { %1002 = vmatprep.subr.bf16.mxu0 %v1969_v38  ;;  %v2062_v38 = vld [vmem:[%s2536_s5 + $0xa4] ss:$8 sps:$4 sm:$0xff]  }
  0x9c   : > { %1250 = vmatpush2.bf16.msra.mxu1 %v2012_v7  ;;  %v2068_v7 = vld [vmem:[%s2536_s5 + $0x84] ss:$8 sps:$4 sm:$0xff]  }
  0x9d   : > { %1251 = vmatprep.subr.bf16.mxu1 %v2017_v8  ;;  %v2066_v8 = vld [vmem:[%s2536_s5 + $0x80] ss:$8 sps:$4 sm:$0xff]  }
  0x9e   : > { %1003 = vmatpush2.bf16.msra.mxu0 %v1967_v39  ;;  %v2060_v39 = vld [vmem:[%s2536_s5 + $0xa0] ss:$8 sps:$4 sm:$0xff]  }
  0x9f   : > { %1004 = vmatprep.subr.bf16.mxu0 %v1972_v40 }
  0xa0   : > { %1252 = vmatpush2.bf16.msra.mxu1 %v2015_v9  ;;  %v1051_v9 = vld [vmem:[%s2535_s4] sm:$0x3] }
  0xa1   : > { %1253 = vmatprep.subr.bf16.mxu1 %v2020_v10  ;;  %v1056_v10 = vrot.slane %v1051_v9, %v404_v50 }
  0xa2   : > { %1005 = vmatpush2.bf16.msra.mxu0 %v1970_v41 }
  0xa3   : > { %1472 = vmatprep.subr.bf16.mxu0 %v2023_v13 }
  0xa4   : > { %1254 = vmatpush2.bf16.msra.mxu1 %v2018_v11  ;;  %v1060_v11 = vrot.slane %v1051_v9, %v408_v52 }
  0xa5   : > { %1007 = vmatmul.mubr.bf16.vlgmr.msra.gmra.mxu0 %v302_v43 }
  0xa6   : > { %1473 = vmatpush1.bf16.msra.mxu0 %v2021_v12 }
  0xa7   : > { %1474 = vmatprep.subr.bf16.mxu0 %v2026_v14 }
  0xaa   : > { %1475 = vmatpush1.bf16.msra.mxu0 %v2024_v15 }
  0xab   : > { %1476 = vmatprep.subr.bf16.mxu0 %v2029_v16 }
  0xae   : > { %1477 = vmatpush1.bf16.msra.mxu0 %v2027_v17 }
  0xaf   : > { %1478 = vmatprep.subr.bf16.mxu0 %v2032_v18 }
  0xb2   : > { %1479 = vmatpush1.bf16.msra.mxu0 %v2030_v19 }
  0xb3   : > { %1480 = vmatprep.subr.bf16.mxu0 %v2035_v20 }
  0xb6   : > { %1481 = vmatpush1.bf16.msra.mxu0 %v2033_v21 }
  0xb7   : > { %1482 = vmatprep.subr.bf16.mxu0 %v2038_v22  ;;  %v1300_v22 = vld [vmem:[%s2537_s6] sm:$0x3] }
  0xba   : > { %1483 = vmatpush1.bf16.msra.mxu0 %v2036_v23  ;;  %v1305_v23 = vrot.slane %v1300_v22, %v404_v50 }
  0xbb   : > { %1484 = vmatprep.subr.bf16.mxu0 %v2041_v24  ;;  %v1309_v24 = vrot.slane %v1300_v22, %v408_v52 }
  0xbe   : > { %1485 = vmatpush1.bf16.msra.mxu0 %v2039_v25 }
  0xbf   : > { %1486 = vmatprep.subr.bf16.mxu0 %v2044_v26 }
  0xc2   : > { %1487 = vmatpush1.bf16.msra.mxu0 %v2042_v27 }
  0xc3   : > { %1488 = vmatprep.subr.bf16.mxu0 %v2047_v28 }
  0xc6   : > { %1489 = vmatpush2.bf16.msra.mxu0 %v2045_v29 }
  0xc7   : > { %1490 = vmatprep.subr.bf16.mxu0 %v2050_v30 }
  0xca   : > { %1491 = vmatpush2.bf16.msra.mxu0 %v2048_v31 }
  0xcb   : > { %1492 = vmatprep.subr.bf16.mxu0 %v2053_v32 }
  0xce   : > { %1493 = vmatpush2.bf16.msra.mxu0 %v2051_v33 }
  0xcf   : > { %1494 = vmatprep.subr.bf16.mxu0 %v2056_v34 }
  0xd2   : > { %1495 = vmatpush2.bf16.msra.mxu0 %v2054_v35 }
  0xd3   : > { %1496 = vmatprep.subr.bf16.mxu0 %v2059_v36 }
  0xd6   : > { %1497 = vmatpush2.bf16.msra.mxu0 %v2057_v37 }
  0xd7   : > { %1498 = vmatprep.subr.bf16.mxu0 %v2062_v38 }
  0xda   : > { %1499 = vmatpush2.bf16.msra.mxu0 %v2060_v39 }
  0xdb   : > { %1500 = vmatprep.subr.bf16.mxu0 %v2065_v5 }
  0xde   : > { %1501 = vmatpush2.bf16.msra.mxu0 %v2063_v6 }
  0xdf   : > { %1502 = vmatprep.subr.bf16.mxu0 %v2068_v7 }
  0xe2   : > { %1503 = vmatpush2.bf16.msra.mxu0 %v2066_v8 }
 0x125   : > { %v926_v40 = vpop.f32.mrf.mxu0 }
 0x126   : > { %v967_v42 = vpop.f32.mrf.mxu1  ;;  %v927_v55 = vadd.f32 %v926_v40, %v405_v53 }
 0x127   : > { %v928_v41 = vpop.f32.mrf.mxu0 }
 0x128   : > { %v969_v44 = vpop.f32.mrf.mxu1  ;;  %v929_v56 = vadd.f32 %v928_v41, %v409_v54  ;;  %v968_v57 = vadd.f32 %v967_v42, %v927_v55 }
 0x129   : > { %v930_v43 = vpop.f32.mrf.mxu0 }
 0x12a   : > { %v971_v46 = vpop.f32.mrf.mxu1  ;;  %v970_v59 = vadd.f32 %v969_v44, %v929_v56 }
 0x12b   : > { %v931_v45 = vpop.f32.mrf.mxu0 }
 0x12c   : > { %v972_v47 = vpop.f32.mrf.mxu1 }
 0x165   : > { %v1008_v58 = vpop.f32.mrf.mxu0 }
 0x166   : > { %v1009_v60 = vadd.f32 %v1008_v58, %v968_v57 }
 0x167   : > { %v1010_v61 = vpop.f32.mrf.mxu0 }
 0x168   : > { %v1011_v62 = vadd.f32 %v1010_v61, %v970_v59  ;;  %v1015_v63 = vmax.f32 %v1009_v60, 0.0 }
 0x169   : > { %v1012_v0 = vpop.f32.mrf.mxu0 }
 0x16a   : > { %v1016_v1 = vmax.f32 %v1011_v62, 0.0  ;;  %v1017_v4 = vpack.c.bf16 %v1015_v63, %v1015_v63 }
 0x16b   : > { %v1013_v2 = vpop.f32.mrf.mxu0 }
 0x16c   : > { %v1018_v3 = vpack.c.bf16 %v1016_v1, %v1016_v1 }
 0x16e   : > { %1255 = vmatprep.mubr.bf16.mxu1 %v1018_v3 }
 0x16f   : > { %1256 = vmatmul.mubr.bf16.vlgmr.msra.gmra.mxu1 %v1017_v4 }
 0x22f   : > { %v1257_v12 = vpop.f32.mrf.mxu1 }
 0x230   : > { %v1258_v13 = vadd.f32 %v1257_v12, %v1056_v10 }
 0x231   : > { %v1259_v14 = vpop.f32.mrf.mxu1 }
 0x232   : > { %v1260_v15 = vadd.f32 %v1259_v14, %v1060_v11  ;;  %v1264_v16 = vmax.f32 %v1258_v13, 0.0 }
 0x233   : > { %v1261_v17 = vpop.f32.mrf.mxu1 }
 0x234   : > { %v1265_v18 = vmax.f32 %v1260_v15, 0.0  ;;  %v1266_v21 = vpack.c.bf16 %v1264_v16, %v1264_v16 }
 0x235   : > { %v1262_v19 = vpop.f32.mrf.mxu1 }
 0x236   : > { %v1267_v20 = vpack.c.bf16 %v1265_v18, %v1265_v18 }
 0x238   : > { %1504 = vmatprep.mubr.bf16.mxu0 %v1267_v20 }
 0x239   : > { %1505 = vmatmul.mubr.bf16.vlgmr.msra.gmra.mxu0 %v1266_v21 }
 0x2f9   : > { %v1506_v25 = vpop.f32.mrf.mxu0 }
 0x2fa   : > { %v1507_v26 = vadd.f32 %v1506_v25, %v1305_v23 }
 0x2fb   : > { %v1508_v27 = vpop.f32.mrf.mxu0 }
 0x2fc   : > { %1513 = vst [vmem:[%s286_s23] sm:$0xff] %v1507_v26  ;;  %v1509_v28 = vadd.f32 %v1508_v27, %v1309_v24 }
 0x2fd   : > { %v1510_v29 = vpop.f32.mrf.mxu0 }
 0x2fe   : > { %1515 = vst.msk [vmem:[%s286_s23 + $0x8] sm:$0xff] %vm1514_vm0, %v1509_v28 }
 0x2ff   : > { %v1511_v30 = vpop.f32.mrf.mxu0 }
 0x300   : > { %2108 = shalt.err (!%p2105_p0)
}
 0x301   : > { %s2109_s19 = scalar_lea.hbm %s2490_s13, 256  ;;  %s2113_s21 = scalar_lea.hbm %s2538_s7, 512 }
 0x302   : > { %p2110_p1 = scmp.ne.s32.totalorder %s2490_s13, %s2109_s19  ;;  %p2114_p4 = scmp.lt.s32.totalorder %s2490_s13, %s2538_s7 }
 0x303   : > { %p2115_p7 = scmp.lt.s32.totalorder %s2113_s21, %s2109_s19 }
 0x304   : > { %p2111_p2 = pnand %p2110_p1, %p2243_p5 }
 0x305   : > { %p2116_p6 = por %p2115_p7, %p2114_p4 }
 0x306   : > { %p2112_p3 = pneg %p2111_p2 }
 0x308   : > { %p2117_p8 = pnand %p2116_p6, %p2112_p3 }
 0x30a   : > { %2120 = shalt.err (!%p2117_p8)
}
 0x30b   : > { %1781 = dma.vmem_to_hbm [thread:$0]  (%p2243_p5), %s2492_s29, 256, %s2490_s13, %s1517_s28  }
 0x30c PF: > { %p1793_p9 = scmp.ge.s32.totalorder %s2159_s27, 2  ;;  %s1543_s8 = sand.u32 1, %s2147_s24  }
 0x30d   : > { %p2542_p10 = scmp.ne.s32.totalorder %s2540_s12, 0  ;;  %s1544_s9 = scalar_lea.sflag [#allocation4], %s1543_s8 }
 0x30f   : > { %p1788_p11 = pnand %p1793_p9, %p2542_p10 }
 0x311   : > { %p1789_p12 = pneg %p1788_p11 }
 0x313   : > { %2142 = dma.done.wait (%p1789_p12), %s1544_s9, 256  }
 0x314   : > { %2144 = vsyncadd (%p1789_p12), %s1544_s9, 4294967040  ;;  %p18_p13 = scmp.ge.s32.totalorder %s2230_s30, 4   ;;  %s2543_s24 = smov %s2151_s25 }
 0x315   : > { %s2544_s25 = smov %s2155_s26  ;;  %s2545_s26 = smov %s2241_s10 }
 0x316   : > { %s2546_s27 = smov %s2230_s30  ;;  %20 = sbr.rel (!%p18_p13) target bundleno = 4 (0x4), region = 88 }
 0x31b   :  { %1549 = vsyncpa [#allocation3], 1 }
 0x31c   :  { %1551 = vsyncpa [#allocation3 + $0x1], 1 }
 0x31d   :  { %1552 = vsyncpa [#allocation4], 1 }
 0x31e   :  { %1554 = vsyncpa [#allocation4 + $0x1], 1 }

</bundles_post_ra>
